<compile_context>
chip_gen: v7x
topology: tpu7x:2x2x1
jax: 0.10.0
libtpu: 0.0.40
codegen_flags: <defaults>
</compile_context>

<pallas_src>
import functools

import jax
import jax.numpy as jnp
from jax.experimental import pallas as pl
from jax.experimental.pallas import tpu as pltpu


def _elu(x):
    # F.elu with alpha=1.0.  The exp argument is clamped so the unselected
    # branch never overflows (result is identical where selected).
    return jnp.where(x > 0, x, jnp.exp(jnp.minimum(x, 0.0)) - 1.0)


def _round_up(x, m):
    return (x + m - 1) // m * m


# ------------------------------- kernel ------------------------------------

def mann_kernel(n_experts,
                x_ref, xmean_ref, xinvstd_ref, ymean_ref, ystd_ref,
                g0w_ref, g0b_ref, g1w_ref, g1b_ref, g2w_ref, g2b_ref,
                e0w_ref, e0b_ref, e1w_ref, e1b_ref, e2w_ref, e2b_ref,
                out_ref):
    x = x_ref[...]                                           # (TB, F) f32
    xn = (x - xmean_ref[...]) * xinvstd_ref[...]             # normalize (1/std folded)
    tb = xn.shape[0]

    def mxu(a, w_ref):
        # bf16 (or f32) operands, f32 accumulation on the MXU.
        return jnp.dot(a.astype(w_ref.dtype), w_ref[...],
                       preferred_element_type=jnp.float32)

    # ---- gating network (tiny; g0 rows for character features are zero, so the
    #      full normalized input is fed directly — no lane slicing) ----
    h = _elu(mxu(xn, g0w_ref) + g0b_ref[...])
    h = _elu(mxu(h, g1w_ref) + g1b_ref[...])
    logits = mxu(h, g2w_ref) + g2b_ref[...]
    logits = logits - jnp.max(logits, axis=1, keepdims=True)
    pe = jnp.exp(logits)
    gate = pe / jnp.sum(pe, axis=1, keepdims=True)           # (TB, n_experts) softmax

    # Hoisted gate slab(s): each gate column broadcast over its per-expert lane
    # chunk, built ONCE and reused by every MoE layer of that width.
    slabs = {}

    def gate_slab(width):
        if width not in slabs:
            slabs[width] = jnp.concatenate(
                [jnp.broadcast_to(gate[:, i:i + 1], (tb, width))
                 for i in range(n_experts)], axis=1)         # (TB, n_experts*width)
        return slabs[width]

    # ---- mixture-of-experts layers (single fused matmul per layer) ----
    def moe(c, w_ref, b_ref):
        width = b_ref.shape[1] // n_experts                  # per-expert out width
        y = (mxu(c, w_ref) + b_ref[...]) * gate_slab(width)  # (TB, n_experts*width)
        acc = y[:, :width]
        for i in range(1, n_experts):                        # n_experts small; unrolled
            acc = acc + y[:, i * width:(i + 1) * width]
        return acc

    # e0 weights have zero rows for the phase features -> full xn feeds it directly.
    c = _elu(moe(xn, e0w_ref, e0b_ref))
    c = _elu(moe(c, e1w_ref, e1b_ref))
    c = moe(c, e2w_ref, e2b_ref)                             # (TB, e2_pad)

    # ---- renormalize (padded lanes carry zeros; sliced off in the wrapper) ----
    out_ref[...] = c * ystd_ref[...] + ymean_ref[...]


# ------------------------------- wrapper ------------------------------------

def _pack_params(params, *, n_char, n_experts, e2_pad, weight_dtype):
    """Stack expert weights along the output dim, pad rows/cols, fold 1/std."""
    F = params["x_norm"].shape[1]
    out_dim = params["e2_W"].shape[2]

    def stack(W, b, pad_rows_before=0, pad_rows_after=0, pad_cols=0):
        E, In, Out = W.shape
        if pad_cols:
            W = jnp.pad(W, ((0, 0), (0, 0), (0, pad_cols)))
            b = jnp.pad(b, ((0, 0), (0, 0), (0, pad_cols)))
            Out += pad_cols
        # columns [i*Out, (i+1)*Out) belong to expert i
        Wc = jnp.transpose(W, (1, 0, 2)).reshape(In, E * Out)
        if pad_rows_before or pad_rows_after:
            Wc = jnp.pad(Wc, ((pad_rows_before, pad_rows_after), (0, 0)))
        bc = b.reshape(1, E * Out)
        return Wc.astype(weight_dtype), bc.astype(jnp.float32)

    # e0: zero rows for the phase features so the full normalized input can be fed.
    e0w, e0b = stack(params["e0_W"], params["e0_b"], pad_rows_after=F - n_char)
    e1w, e1b = stack(params["e1_W"], params["e1_b"])
    # e2: per-expert output padded only up to e2_pad (e.g. 20 -> 32), not 128.
    e2w, e2b = stack(params["e2_W"], params["e2_b"], pad_cols=e2_pad - out_dim)

    # g0: zero rows for the character features (phase features live at columns
    # n_char..F-1 of the normalized input).
    g0w = jnp.pad(params["g0_w"], ((n_char, 0), (0, 0))).astype(weight_dtype)

    x_mean = params["x_norm"][0:1].astype(jnp.float32)
    x_inv_std = (1.0 / params["x_norm"][1:2]).astype(jnp.float32)   # reciprocal folded
    y_mean = jnp.pad(params["y_norm"][0:1], ((0, 0), (0, e2_pad - out_dim)))
    y_std = jnp.pad(params["y_norm"][1:2], ((0, 0), (0, e2_pad - out_dim)),
                    constant_values=1.0)

    return (x_mean, x_inv_std, y_mean.astype(jnp.float32), y_std.astype(jnp.float32),
            g0w, params["g0_b"].astype(jnp.float32),
            params["g1_w"].astype(weight_dtype), params["g1_b"].astype(jnp.float32),
            params["g2_w"].astype(weight_dtype), params["g2_b"].astype(jnp.float32),
            e0w, e0b, e1w, e1b, e2w, e2b)


def mann_forward(x, params, *, n_char, n_experts,
                 block_b=2048, weight_dtype=jnp.bfloat16):
    B, F = x.shape
    out_dim = params["y_norm"].shape[1]
    main_hidden = params["e0_W"].shape[2]

    # Per-expert output padding of the last MoE layer: small (sublane multiple);
    # prefer main_hidden so every MoE layer shares the same chunk width / gate slab.
    e2_pad = _round_up(out_dim, 8)
    if e2_pad <= main_hidden:
        e2_pad = main_hidden

    # Batch tile: >=8 (sublane), <=block_b; pad batch to a multiple of the tile.
    tb = min(block_b, _round_up(B, 8))
    # Prefer >=2 grid steps so v7x's two TensorCores both get work.
    if B > 8 and _round_up(B, tb) // tb < 2:
        tb = _round_up(pl.cdiv(B, 2), 8)
    b_pad = _round_up(B, tb)
    if b_pad != B:
        x = jnp.pad(x, ((0, b_pad - B), (0, 0)))

    packed = _pack_params(params, n_char=n_char, n_experts=n_experts,
                          e2_pad=e2_pad, weight_dtype=weight_dtype)

    kernel = functools.partial(mann_kernel, n_experts)

    # Weights / norm params: full-array blocks, constant index_map -> DMA'd once,
    # VMEM-resident across the whole batch grid.
    const_specs = [pl.BlockSpec(a.shape, lambda i: (0, 0)) for a in packed]
    in_specs = [pl.BlockSpec((tb, F), lambda i: (i, 0))] + const_specs

    out = pl.pallas_call(
        kernel,
        out_shape=jax.ShapeDtypeStruct((b_pad, e2_pad), jnp.float32),
        grid=(b_pad // tb,),
        in_specs=in_specs,
        out_specs=pl.BlockSpec((tb, e2_pad), lambda i: (i, 0)),
        compiler_params=pltpu.CompilerParams(
            dimension_semantics=("parallel",),
            vmem_limit_bytes=32 * 1024 * 1024),
    )(x, *packed)

    return out[:B, :out_dim]


# ------------------------ parameter construction ----------------------------

def make_params(key, *, n_char, n_gating, gating_hidden, n_experts,
                main_hidden, out_dim):
    def uniform(k, shape, bound):
        return jax.random.uniform(k, shape, jnp.float32, -bound, bound)

    keys = jax.random.split(key, 16)
    F = n_char + n_gating

    def expert_bound(in_d, out_d):
        return jnp.sqrt(6.0 / (in_d * out_d))

    params = {
        # norm rows: [0] = mean, [1] = std
        "x_norm": jnp.concatenate(
            [jax.random.normal(keys[0], (1, F)) * 0.1,
             1.0 + 0.1 * jnp.abs(jax.random.normal(keys[1], (1, F)))], axis=0),
        "y_norm": jnp.concatenate(
            [jax.random.normal(keys[2], (1, out_dim)) * 0.1,
             1.0 + 0.1 * jnp.abs(jax.random.normal(keys[3], (1, out_dim)))],
            axis=0),
        # gating Linear layers (weights stored as (in, out))
        "g0_w": uniform(keys[4], (n_gating, gating_hidden),
                        1.0 / jnp.sqrt(n_gating)),
        "g0_b": uniform(keys[5], (1, gating_hidden), 1.0 / jnp.sqrt(n_gating)),
        "g1_w": uniform(keys[6], (gating_hidden, gating_hidden),
                        1.0 / jnp.sqrt(gating_hidden)),
        "g1_b": uniform(keys[7], (1, gating_hidden),
                        1.0 / jnp.sqrt(gating_hidden)),
        "g2_w": uniform(keys[8], (gating_hidden, n_experts),
                        1.0 / jnp.sqrt(gating_hidden)),
        "g2_b": uniform(keys[9], (1, n_experts), 1.0 / jnp.sqrt(gating_hidden)),
        # ExpertsLinear layers
        "e0_W": uniform(keys[10], (n_experts, n_char, main_hidden),
                        expert_bound(n_char, main_hidden)),
        "e0_b": jnp.zeros((n_experts, 1, main_hidden), jnp.float32),
        "e1_W": uniform(keys[11], (n_experts, main_hidden, main_hidden),
                        expert_bound(main_hidden, main_hidden)),
        "e1_b": jnp.zeros((n_experts, 1, main_hidden), jnp.float32),
        "e2_W": uniform(keys[12], (n_experts, main_hidden, out_dim),
                        expert_bound(main_hidden, out_dim)),
        "e2_b": jnp.zeros((n_experts, 1, out_dim), jnp.float32),
    }
    return params


# ------------------------------ reference -----------------------------------

def mann_reference(x, p, *, n_char, n_experts, matmul_dtype=jnp.float32):
    def dot(a, w):
        return jnp.dot(a.astype(matmul_dtype), w.astype(matmul_dtype),
                       preferred_element_type=jnp.float32)

    xn = (x - p["x_norm"][0:1]) / p["x_norm"][1:2]
    char, phase = xn[:, :n_char], xn[:, n_char:]
    h = _elu(dot(phase, p["g0_w"]) + p["g0_b"])
    h = _elu(dot(h, p["g1_w"]) + p["g1_b"])
    w = jax.nn.softmax(dot(h, p["g2_w"]) + p["g2_b"], axis=1)

    def moe(c, W, b):
        y = 0.0
        for i in range(n_experts):
            y = y + w[:, i:i + 1] * (dot(c, W[i]) + b[i])
        return y

    c = _elu(moe(char, p["e0_W"], p["e0_b"]))
    c = _elu(moe(c, p["e1_W"], p["e1_b"]))
    c = moe(c, p["e2_W"], p["e2_b"])
    return c * p["y_norm"][1:2] + p["y_norm"][0:1]


if __name__ == "__main__":
    # Small shapes consistent with the module's forward.
    B = 8
    N_CHAR = 24          # character features
    N_GATING = 8         # phase (gating) features
    GATING_HIDDEN = 16
    N_EXPERTS = 4
    MAIN_HIDDEN = 32     # 4 experts x 32 = 128 lanes exactly
    OUT_DIM = 20

    key = jax.random.PRNGKey(0)
    kp, kx = jax.random.split(key)
    params = make_params(kp, n_char=N_CHAR, n_gating=N_GATING,
                         gating_hidden=GATING_HIDDEN, n_experts=N_EXPERTS,
                         main_hidden=MAIN_HIDDEN, out_dim=OUT_DIM)
    x = jax.random.normal(kx, (B, N_CHAR + N_GATING), jnp.float32)

    out = mann_forward(x, params, n_char=N_CHAR, n_experts=N_EXPERTS)
    out = jax.block_until_ready(out)
    assert out.shape == (B, OUT_DIM)

    # Tight check vs a reference using the same bf16 matmul operands.
    ref_bf16 = mann_reference(x, params, n_char=N_CHAR, n_experts=N_EXPERTS,
                              matmul_dtype=jnp.bfloat16)
    assert jnp.allclose(out, ref_bf16, atol=1e-2, rtol=1e-2), \
        "mismatch vs bf16-matched reference"

    # Loose check vs the pure-f32 (PyTorch-semantics) reference.
    ref_f32 = mann_reference(x, params, n_char=N_CHAR, n_experts=N_EXPERTS)
    assert jnp.allclose(out, ref_f32, atol=5e-2, rtol=5e-2), \
        "mismatch vs f32 reference"

    print("KERNEL_OK")
</pallas_src>

<mosaic_0001>
module attributes {stable_mosaic.version = 11 : i64} {
  func.func @mann_kernel(%arg0: i32, %arg1: memref<8x32xf32, #tpu.memory_space<vmem>>, %arg2: memref<1x32xf32, #tpu.memory_space<vmem>>, %arg3: memref<1x32xf32, #tpu.memory_space<vmem>>, %arg4: memref<1x32xf32, #tpu.memory_space<vmem>>, %arg5: memref<1x32xf32, #tpu.memory_space<vmem>>, %arg6: memref<32x16xbf16, #tpu.memory_space<vmem>>, %arg7: memref<1x16xf32, #tpu.memory_space<vmem>>, %arg8: memref<16x16xbf16, #tpu.memory_space<vmem>>, %arg9: memref<1x16xf32, #tpu.memory_space<vmem>>, %arg10: memref<16x4xbf16, #tpu.memory_space<vmem>>, %arg11: memref<1x4xf32, #tpu.memory_space<vmem>>, %arg12: memref<32x128xbf16, #tpu.memory_space<vmem>>, %arg13: memref<1x128xf32, #tpu.memory_space<vmem>>, %arg14: memref<32x128xbf16, #tpu.memory_space<vmem>>, %arg15: memref<1x128xf32, #tpu.memory_space<vmem>>, %arg16: memref<32x128xbf16, #tpu.memory_space<vmem>>, %arg17: memref<1x128xf32, #tpu.memory_space<vmem>>, %arg18: memref<8x32xf32, #tpu.memory_space<vmem>>) attributes {dimension_semantics = [#tpu.dimension_semantics<parallel>], iteration_bounds = array<i64: 1>, scalar_prefetch = 0 : i64, scratch_operands = 0 : i64, tpu.core_type = #tpu.core_type<tc>, window_params = [{transform_indices = @transform_0, window_bounds = array<i64: 8, 32>}, {pipeline_mode = #tpu.pipeline_mode<synchronous>, transform_indices = @transform_1, window_bounds = array<i64: 1, 32>}, {pipeline_mode = #tpu.pipeline_mode<synchronous>, transform_indices = @transform_2, window_bounds = array<i64: 1, 32>}, {pipeline_mode = #tpu.pipeline_mode<synchronous>, transform_indices = @transform_3, window_bounds = array<i64: 1, 32>}, {pipeline_mode = #tpu.pipeline_mode<synchronous>, transform_indices = @transform_4, window_bounds = array<i64: 1, 32>}, {pipeline_mode = #tpu.pipeline_mode<synchronous>, transform_indices = @transform_5, window_bounds = array<i64: 32, 16>}, {pipeline_mode = #tpu.pipeline_mode<synchronous>, transform_indices = @transform_6, window_bounds = array<i64: 1, 16>}, {pipeline_mode = #tpu.pipeline_mode<synchronous>, transform_indices = @transform_7, window_bounds = array<i64: 16, 16>}, {pipeline_mode = #tpu.pipeline_mode<synchronous>, transform_indices = @transform_8, window_bounds = array<i64: 1, 16>}, {pipeline_mode = #tpu.pipeline_mode<synchronous>, transform_indices = @transform_9, window_bounds = array<i64: 16, 4>}, {pipeline_mode = #tpu.pipeline_mode<synchronous>, transform_indices = @transform_10, window_bounds = array<i64: 1, 4>}, {pipeline_mode = #tpu.pipeline_mode<synchronous>, transform_indices = @transform_11, window_bounds = array<i64: 32, 128>}, {pipeline_mode = #tpu.pipeline_mode<synchronous>, transform_indices = @transform_12, window_bounds = array<i64: 1, 128>}, {pipeline_mode = #tpu.pipeline_mode<synchronous>, transform_indices = @transform_13, window_bounds = array<i64: 32, 128>}, {pipeline_mode = #tpu.pipeline_mode<synchronous>, transform_indices = @transform_14, window_bounds = array<i64: 1, 128>}, {pipeline_mode = #tpu.pipeline_mode<synchronous>, transform_indices = @transform_15, window_bounds = array<i64: 32, 128>}, {pipeline_mode = #tpu.pipeline_mode<synchronous>, transform_indices = @transform_16, window_bounds = array<i64: 1, 128>}, {transform_indices = @transform_17, window_bounds = array<i64: 8, 32>}]} {
    %c0 = arith.constant 0 : index
    %c0_0 = arith.constant 0 : index
    %0 = vector.load %arg1[%c0, %c0_0] : memref<8x32xf32, #tpu.memory_space<vmem>>, vector<8x32xf32>
    %c0_1 = arith.constant 0 : index
    %c0_2 = arith.constant 0 : index
    %1 = vector.load %arg2[%c0_1, %c0_2] : memref<1x32xf32, #tpu.memory_space<vmem>>, vector<1x32xf32>
    %2 = vector.broadcast %1 : vector<1x32xf32> to vector<8x32xf32>
    %3 = arith.subf %0, %2 : vector<8x32xf32>
    %c0_3 = arith.constant 0 : index
    %c0_4 = arith.constant 0 : index
    %4 = vector.load %arg3[%c0_3, %c0_4] : memref<1x32xf32, #tpu.memory_space<vmem>>, vector<1x32xf32>
    %5 = vector.broadcast %4 : vector<1x32xf32> to vector<8x32xf32>
    %6 = arith.mulf %3, %5 : vector<8x32xf32>
    %7 = arith.truncf %6 : vector<8x32xf32> to vector<8x32xbf16>
    %c0_5 = arith.constant 0 : index
    %c0_6 = arith.constant 0 : index
    %8 = vector.load %arg6[%c0_5, %c0_6] : memref<32x16xbf16, #tpu.memory_space<vmem>>, vector<32x16xbf16>
    %cst = arith.constant dense<0.000000e+00> : vector<8x16xf32>
    %9 = tpu.matmul %7, %8, %cst {dimension_numbers = #tpu.dot_dimension_numbers<[1], [0], [0], [1], [0, 0, 1, 1], [], []>} : vector<8x32xbf16>, vector<32x16xbf16>, vector<8x16xf32> -> vector<8x16xf32>
    %c0_7 = arith.constant 0 : index
    %c0_8 = arith.constant 0 : index
    %10 = vector.load %arg7[%c0_7, %c0_8] : memref<1x16xf32, #tpu.memory_space<vmem>>, vector<1x16xf32>
    %11 = vector.broadcast %10 : vector<1x16xf32> to vector<8x16xf32>
    %12 = arith.addf %9, %11 : vector<8x16xf32>
    %cst_9 = arith.constant 0.000000e+00 : f32
    %13 = vector.broadcast %cst_9 : f32 to vector<8x16xf32>
    %14 = arith.cmpf ogt, %12, %13 : vector<8x16xf32>
    %cst_10 = arith.constant 0.000000e+00 : f32
    %15 = vector.broadcast %cst_10 : f32 to vector<8x16xf32>
    %16 = arith.minimumf %12, %15 : vector<8x16xf32>
    %17 = math.exp %16 : vector<8x16xf32>
    %cst_11 = arith.constant 1.000000e+00 : f32
    %18 = vector.broadcast %cst_11 : f32 to vector<8x16xf32>
    %19 = arith.subf %17, %18 : vector<8x16xf32>
    %20 = arith.select %14, %12, %19 : vector<8x16xi1>, vector<8x16xf32>
    %21 = arith.truncf %20 : vector<8x16xf32> to vector<8x16xbf16>
    %c0_12 = arith.constant 0 : index
    %c0_13 = arith.constant 0 : index
    %22 = vector.load %arg8[%c0_12, %c0_13] : memref<16x16xbf16, #tpu.memory_space<vmem>>, vector<16x16xbf16>
    %cst_14 = arith.constant dense<0.000000e+00> : vector<8x16xf32>
    %23 = tpu.matmul %21, %22, %cst_14 {dimension_numbers = #tpu.dot_dimension_numbers<[1], [0], [0], [1], [0, 0, 1, 1], [], []>} : vector<8x16xbf16>, vector<16x16xbf16>, vector<8x16xf32> -> vector<8x16xf32>
    %c0_15 = arith.constant 0 : index
    %c0_16 = arith.constant 0 : index
    %24 = vector.load %arg9[%c0_15, %c0_16] : memref<1x16xf32, #tpu.memory_space<vmem>>, vector<1x16xf32>
    %25 = vector.broadcast %24 : vector<1x16xf32> to vector<8x16xf32>
    %26 = arith.addf %23, %25 : vector<8x16xf32>
    %cst_17 = arith.constant 0.000000e+00 : f32
    %27 = vector.broadcast %cst_17 : f32 to vector<8x16xf32>
    %28 = arith.cmpf ogt, %26, %27 : vector<8x16xf32>
    %cst_18 = arith.constant 0.000000e+00 : f32
    %29 = vector.broadcast %cst_18 : f32 to vector<8x16xf32>
    %30 = arith.minimumf %26, %29 : vector<8x16xf32>
    %31 = math.exp %30 : vector<8x16xf32>
    %cst_19 = arith.constant 1.000000e+00 : f32
    %32 = vector.broadcast %cst_19 : f32 to vector<8x16xf32>
    %33 = arith.subf %31, %32 : vector<8x16xf32>
    %34 = arith.select %28, %26, %33 : vector<8x16xi1>, vector<8x16xf32>
    %35 = arith.truncf %34 : vector<8x16xf32> to vector<8x16xbf16>
    %c0_20 = arith.constant 0 : index
    %c0_21 = arith.constant 0 : index
    %36 = vector.load %arg10[%c0_20, %c0_21] : memref<16x4xbf16, #tpu.memory_space<vmem>>, vector<16x4xbf16>
    %cst_22 = arith.constant dense<0.000000e+00> : vector<8x4xf32>
    %37 = tpu.matmul %35, %36, %cst_22 {dimension_numbers = #tpu.dot_dimension_numbers<[1], [0], [0], [1], [0, 0, 1, 1], [], []>} : vector<8x16xbf16>, vector<16x4xbf16>, vector<8x4xf32> -> vector<8x4xf32>
    %c0_23 = arith.constant 0 : index
    %c0_24 = arith.constant 0 : index
    %38 = vector.load %arg11[%c0_23, %c0_24] : memref<1x4xf32, #tpu.memory_space<vmem>>, vector<1x4xf32>
    %39 = vector.broadcast %38 : vector<1x4xf32> to vector<8x4xf32>
    %40 = arith.addf %37, %39 : vector<8x4xf32>
    %cst_25 = arith.constant dense<0xFF800000> : vector<8xf32>
    %41 = vector.multi_reduction <maximumf>, %40, %cst_25 [1] : vector<8x4xf32> to vector<8xf32>
    %42 = vector.shape_cast %41 : vector<8xf32> to vector<8x1xf32>
    %43 = vector.broadcast %42 : vector<8x1xf32> to vector<8x4xf32>
    %44 = arith.subf %40, %43 : vector<8x4xf32>
    %45 = math.exp %44 : vector<8x4xf32>
    %cst_26 = arith.constant dense<0.000000e+00> : vector<8xf32>
    %46 = vector.multi_reduction <add>, %45, %cst_26 [1] : vector<8x4xf32> to vector<8xf32>
    %47 = vector.shape_cast %46 : vector<8xf32> to vector<8x1xf32>
    %48 = vector.broadcast %47 : vector<8x1xf32> to vector<8x4xf32>
    %49 = arith.divf %45, %48 : vector<8x4xf32>
    %50 = arith.truncf %6 : vector<8x32xf32> to vector<8x32xbf16>
    %c0_27 = arith.constant 0 : index
    %c0_28 = arith.constant 0 : index
    %51 = vector.load %arg12[%c0_27, %c0_28] : memref<32x128xbf16, #tpu.memory_space<vmem>>, vector<32x128xbf16>
    %cst_29 = arith.constant dense<0.000000e+00> : vector<8x128xf32>
    %52 = tpu.matmul %50, %51, %cst_29 {dimension_numbers = #tpu.dot_dimension_numbers<[1], [0], [0], [1], [0, 0, 1, 1], [], []>} : vector<8x32xbf16>, vector<32x128xbf16>, vector<8x128xf32> -> vector<8x128xf32>
    %c0_30 = arith.constant 0 : index
    %c0_31 = arith.constant 0 : index
    %53 = vector.load %arg13[%c0_30, %c0_31] : memref<1x128xf32, #tpu.memory_space<vmem>>, vector<1x128xf32>
    %54 = vector.broadcast %53 : vector<1x128xf32> to vector<8x128xf32>
    %55 = arith.addf %52, %54 : vector<8x128xf32>
    %56 = vector.extract_strided_slice %49 {offsets = [0, 0], sizes = [8, 1], strides = [1, 1]} : vector<8x4xf32> to vector<8x1xf32>
    %57 = vector.shape_cast %56 : vector<8x1xf32> to vector<8x1xf32>
    %58 = vector.broadcast %57 : vector<8x1xf32> to vector<8x32xf32>
    %59 = vector.extract_strided_slice %49 {offsets = [0, 1], sizes = [8, 1], strides = [1, 1]} : vector<8x4xf32> to vector<8x1xf32>
    %60 = vector.shape_cast %59 : vector<8x1xf32> to vector<8x1xf32>
    %61 = vector.broadcast %60 : vector<8x1xf32> to vector<8x32xf32>
    %62 = vector.extract_strided_slice %49 {offsets = [0, 2], sizes = [8, 1], strides = [1, 1]} : vector<8x4xf32> to vector<8x1xf32>
    %63 = vector.shape_cast %62 : vector<8x1xf32> to vector<8x1xf32>
    %64 = vector.broadcast %63 : vector<8x1xf32> to vector<8x32xf32>
    %65 = vector.extract_strided_slice %49 {offsets = [0, 3], sizes = [8, 1], strides = [1, 1]} : vector<8x4xf32> to vector<8x1xf32>
    %66 = vector.shape_cast %65 : vector<8x1xf32> to vector<8x1xf32>
    %67 = vector.broadcast %66 : vector<8x1xf32> to vector<8x32xf32>
    %68 = tpu.concatenate %58, %61, %64, %67 in 1 : vector<8x32xf32>, vector<8x32xf32>, vector<8x32xf32>, vector<8x32xf32> -> vector<8x128xf32>
    %69 = arith.mulf %55, %68 : vector<8x128xf32>
    %70 = vector.extract_strided_slice %69 {offsets = [0, 0], sizes = [8, 32], strides = [1, 1]} : vector<8x128xf32> to vector<8x32xf32>
    %71 = vector.extract_strided_slice %69 {offsets = [0, 32], sizes = [8, 32], strides = [1, 1]} : vector<8x128xf32> to vector<8x32xf32>
    %72 = arith.addf %70, %71 : vector<8x32xf32>
    %73 = vector.extract_strided_slice %69 {offsets = [0, 64], sizes = [8, 32], strides = [1, 1]} : vector<8x128xf32> to vector<8x32xf32>
    %74 = arith.addf %72, %73 : vector<8x32xf32>
    %75 = vector.extract_strided_slice %69 {offsets = [0, 96], sizes = [8, 32], strides = [1, 1]} : vector<8x128xf32> to vector<8x32xf32>
    %76 = arith.addf %74, %75 : vector<8x32xf32>
    %cst_32 = arith.constant 0.000000e+00 : f32
    %77 = vector.broadcast %cst_32 : f32 to vector<8x32xf32>
    %78 = arith.cmpf ogt, %76, %77 : vector<8x32xf32>
    %cst_33 = arith.constant 0.000000e+00 : f32
    %79 = vector.broadcast %cst_33 : f32 to vector<8x32xf32>
    %80 = arith.minimumf %76, %79 : vector<8x32xf32>
    %81 = math.exp %80 : vector<8x32xf32>
    %cst_34 = arith.constant 1.000000e+00 : f32
    %82 = vector.broadcast %cst_34 : f32 to vector<8x32xf32>
    %83 = arith.subf %81, %82 : vector<8x32xf32>
    %84 = arith.select %78, %76, %83 : vector<8x32xi1>, vector<8x32xf32>
    %85 = arith.truncf %84 : vector<8x32xf32> to vector<8x32xbf16>
    %c0_35 = arith.constant 0 : index
    %c0_36 = arith.constant 0 : index
    %86 = vector.load %arg14[%c0_35, %c0_36] : memref<32x128xbf16, #tpu.memory_space<vmem>>, vector<32x128xbf16>
    %cst_37 = arith.constant dense<0.000000e+00> : vector<8x128xf32>
    %87 = tpu.matmul %85, %86, %cst_37 {dimension_numbers = #tpu.dot_dimension_numbers<[1], [0], [0], [1], [0, 0, 1, 1], [], []>} : vector<8x32xbf16>, vector<32x128xbf16>, vector<8x128xf32> -> vector<8x128xf32>
    %c0_38 = arith.constant 0 : index
    %c0_39 = arith.constant 0 : index
    %88 = vector.load %arg15[%c0_38, %c0_39] : memref<1x128xf32, #tpu.memory_space<vmem>>, vector<1x128xf32>
    %89 = vector.broadcast %88 : vector<1x128xf32> to vector<8x128xf32>
    %90 = arith.addf %87, %89 : vector<8x128xf32>
    %91 = arith.mulf %90, %68 : vector<8x128xf32>
    %92 = vector.extract_strided_slice %91 {offsets = [0, 0], sizes = [8, 32], strides = [1, 1]} : vector<8x128xf32> to vector<8x32xf32>
    %93 = vector.extract_strided_slice %91 {offsets = [0, 32], sizes = [8, 32], strides = [1, 1]} : vector<8x128xf32> to vector<8x32xf32>
    %94 = arith.addf %92, %93 : vector<8x32xf32>
    %95 = vector.extract_strided_slice %91 {offsets = [0, 64], sizes = [8, 32], strides = [1, 1]} : vector<8x128xf32> to vector<8x32xf32>
    %96 = arith.addf %94, %95 : vector<8x32xf32>
    %97 = vector.extract_strided_slice %91 {offsets = [0, 96], sizes = [8, 32], strides = [1, 1]} : vector<8x128xf32> to vector<8x32xf32>
    %98 = arith.addf %96, %97 : vector<8x32xf32>
    %cst_40 = arith.constant 0.000000e+00 : f32
    %99 = vector.broadcast %cst_40 : f32 to vector<8x32xf32>
    %100 = arith.cmpf ogt, %98, %99 : vector<8x32xf32>
    %cst_41 = arith.constant 0.000000e+00 : f32
    %101 = vector.broadcast %cst_41 : f32 to vector<8x32xf32>
    %102 = arith.minimumf %98, %101 : vector<8x32xf32>
    %103 = math.exp %102 : vector<8x32xf32>
    %cst_42 = arith.constant 1.000000e+00 : f32
    %104 = vector.broadcast %cst_42 : f32 to vector<8x32xf32>
    %105 = arith.subf %103, %104 : vector<8x32xf32>
    %106 = arith.select %100, %98, %105 : vector<8x32xi1>, vector<8x32xf32>
    %107 = arith.truncf %106 : vector<8x32xf32> to vector<8x32xbf16>
    %c0_43 = arith.constant 0 : index
    %c0_44 = arith.constant 0 : index
    %108 = vector.load %arg16[%c0_43, %c0_44] : memref<32x128xbf16, #tpu.memory_space<vmem>>, vector<32x128xbf16>
    %cst_45 = arith.constant dense<0.000000e+00> : vector<8x128xf32>
    %109 = tpu.matmul %107, %108, %cst_45 {dimension_numbers = #tpu.dot_dimension_numbers<[1], [0], [0], [1], [0, 0, 1, 1], [], []>} : vector<8x32xbf16>, vector<32x128xbf16>, vector<8x128xf32> -> vector<8x128xf32>
    %c0_46 = arith.constant 0 : index
    %c0_47 = arith.constant 0 : index
    %110 = vector.load %arg17[%c0_46, %c0_47] : memref<1x128xf32, #tpu.memory_space<vmem>>, vector<1x128xf32>
    %111 = vector.broadcast %110 : vector<1x128xf32> to vector<8x128xf32>
    %112 = arith.addf %109, %111 : vector<8x128xf32>
    %113 = arith.mulf %112, %68 : vector<8x128xf32>
    %114 = vector.extract_strided_slice %113 {offsets = [0, 0], sizes = [8, 32], strides = [1, 1]} : vector<8x128xf32> to vector<8x32xf32>
    %115 = vector.extract_strided_slice %113 {offsets = [0, 32], sizes = [8, 32], strides = [1, 1]} : vector<8x128xf32> to vector<8x32xf32>
    %116 = arith.addf %114, %115 : vector<8x32xf32>
    %117 = vector.extract_strided_slice %113 {offsets = [0, 64], sizes = [8, 32], strides = [1, 1]} : vector<8x128xf32> to vector<8x32xf32>
    %118 = arith.addf %116, %117 : vector<8x32xf32>
    %119 = vector.extract_strided_slice %113 {offsets = [0, 96], sizes = [8, 32], strides = [1, 1]} : vector<8x128xf32> to vector<8x32xf32>
    %120 = arith.addf %118, %119 : vector<8x32xf32>
    %c0_48 = arith.constant 0 : index
    %c0_49 = arith.constant 0 : index
    %121 = vector.load %arg5[%c0_48, %c0_49] : memref<1x32xf32, #tpu.memory_space<vmem>>, vector<1x32xf32>
    %122 = vector.broadcast %121 : vector<1x32xf32> to vector<8x32xf32>
    %123 = arith.mulf %120, %122 : vector<8x32xf32>
    %c0_50 = arith.constant 0 : index
    %c0_51 = arith.constant 0 : index
    %124 = vector.load %arg4[%c0_50, %c0_51] : memref<1x32xf32, #tpu.memory_space<vmem>>, vector<1x32xf32>
    %125 = vector.broadcast %124 : vector<1x32xf32> to vector<8x32xf32>
    %126 = arith.addf %123, %125 : vector<8x32xf32>
    %c0_52 = arith.constant 0 : index
    %c0_53 = arith.constant 0 : index
    %127 = vector.load %arg18[%c0_52, %c0_53] : memref<8x32xf32, #tpu.memory_space<vmem>>, vector<8x32xf32>
    tpu.vector_store %arg18[%c0_52, %c0_53], %126 {strides = array<i32>} : memref<8x32xf32, #tpu.memory_space<vmem>>, vector<8x32xf32>,
    return
  }
  func.func @transform_0(%arg0: i32) -> (i32, i32) {
    %c0_i32 = arith.constant 0 : i32
    %c0_i32_0 = arith.constant 0 : i32
    return %arg0, %c0_i32 : i32, i32
  }
  func.func @transform_1(%arg0: i32) -> (i32, i32) {
    %c0_i32 = arith.constant 0 : i32
    %c0_i32_0 = arith.constant 0 : i32
    %c0_i32_1 = arith.constant 0 : i32
    return %c0_i32, %c0_i32_0 : i32, i32
  }
  func.func @transform_2(%arg0: i32) -> (i32, i32) {
    %c0_i32 = arith.constant 0 : i32
    %c0_i32_0 = arith.constant 0 : i32
    %c0_i32_1 = arith.constant 0 : i32
    return %c0_i32, %c0_i32_0 : i32, i32
  }
  func.func @transform_3(%arg0: i32) -> (i32, i32) {
    %c0_i32 = arith.constant 0 : i32
    %c0_i32_0 = arith.constant 0 : i32
    %c0_i32_1 = arith.constant 0 : i32
    return %c0_i32, %c0_i32_0 : i32, i32
  }
  func.func @transform_4(%arg0: i32) -> (i32, i32) {
    %c0_i32 = arith.constant 0 : i32
    %c0_i32_0 = arith.constant 0 : i32
    %c0_i32_1 = arith.constant 0 : i32
    return %c0_i32, %c0_i32_0 : i32, i32
  }
  func.func @transform_5(%arg0: i32) -> (i32, i32) {
    %c0_i32 = arith.constant 0 : i32
    %c0_i32_0 = arith.constant 0 : i32
    %c0_i32_1 = arith.constant 0 : i32
    return %c0_i32, %c0_i32_0 : i32, i32
  }
  func.func @transform_6(%arg0: i32) -> (i32, i32) {
    %c0_i32 = arith.constant 0 : i32
    %c0_i32_0 = arith.constant 0 : i32
    %c0_i32_1 = arith.constant 0 : i32
    return %c0_i32, %c0_i32_0 : i32, i32
  }
  func.func @transform_7(%arg0: i32) -> (i32, i32) {
    %c0_i32 = arith.constant 0 : i32
    %c0_i32_0 = arith.constant 0 : i32
    %c0_i32_1 = arith.constant 0 : i32
    return %c0_i32, %c0_i32_0 : i32, i32
  }
  func.func @transform_8(%arg0: i32) -> (i32, i32) {
    %c0_i32 = arith.constant 0 : i32
    %c0_i32_0 = arith.constant 0 : i32
    %c0_i32_1 = arith.constant 0 : i32
    return %c0_i32, %c0_i32_0 : i32, i32
  }
  func.func @transform_9(%arg0: i32) -> (i32, i32) {
    %c0_i32 = arith.constant 0 : i32
    %c0_i32_0 = arith.constant 0 : i32
    %c0_i32_1 = arith.constant 0 : i32
    return %c0_i32, %c0_i32_0 : i32, i32
  }
  func.func @transform_10(%arg0: i32) -> (i32, i32) {
    %c0_i32 = arith.constant 0 : i32
    %c0_i32_0 = arith.constant 0 : i32
    %c0_i32_1 = arith.constant 0 : i32
    return %c0_i32, %c0_i32_0 : i32, i32
  }
  func.func @transform_11(%arg0: i32) -> (i32, i32) {
    %c0_i32 = arith.constant 0 : i32
    %c0_i32_0 = arith.constant 0 : i32
    %c0_i32_1 = arith.constant 0 : i32
    return %c0_i32, %c0_i32_0 : i32, i32
  }
  func.func @transform_12(%arg0: i32) -> (i32, i32) {
    %c0_i32 = arith.constant 0 : i32
    %c0_i32_0 = arith.constant 0 : i32
    %c0_i32_1 = arith.constant 0 : i32
    return %c0_i32, %c0_i32_0 : i32, i32
  }
  func.func @transform_13(%arg0: i32) -> (i32, i32) {
    %c0_i32 = arith.constant 0 : i32
    %c0_i32_0 = arith.constant 0 : i32
    %c0_i32_1 = arith.constant 0 : i32
    return %c0_i32, %c0_i32_0 : i32, i32
  }
  func.func @transform_14(%arg0: i32) -> (i32, i32) {
    %c0_i32 = arith.constant 0 : i32
    %c0_i32_0 = arith.constant 0 : i32
    %c0_i32_1 = arith.constant 0 : i32
    return %c0_i32, %c0_i32_0 : i32, i32
  }
  func.func @transform_15(%arg0: i32) -> (i32, i32) {
    %c0_i32 = arith.constant 0 : i32
    %c0_i32_0 = arith.constant 0 : i32
    %c0_i32_1 = arith.constant 0 : i32
    return %c0_i32, %c0_i32_0 : i32, i32
  }
  func.func @transform_16(%arg0: i32) -> (i32, i32) {
    %c0_i32 = arith.constant 0 : i32
    %c0_i32_0 = arith.constant 0 : i32
    %c0_i32_1 = arith.constant 0 : i32
    return %c0_i32, %c0_i32_0 : i32, i32
  }
  func.func @transform_17(%arg0: i32) -> (i32, i32) {
    %c0_i32 = arith.constant 0 : i32
    %c0_i32_0 = arith.constant 0 : i32
    return %arg0, %c0_i32 : i32, i32
  }
}

</mosaic_0001>

<bundles_post_ra>
// kernel: tpu_custom_call.1
= control target key start
LH: loop header
LB: loop body
LE: loop exit
PB: predicated region body
PF: predicated region fallthrough
CT: control target
= control target key end

     0   :  { %s1242_s0 = inlined_call_operand.hbm [shape: f32[8,32], index: 0, kind: input, shape index: {}]   ;;  %s1243_s1 = inlined_call_operand.hbm [shape: f32[1,32], index: 1, kind: input, shape index: {}]   ;;  %s1244_s2 = inlined_call_operand.hbm [shape: f32[1,32], index: 2, kind: input, shape index: {}]   ;;  %s1245_s3 = inlined_call_operand.hbm [shape: f32[1,32], index: 3, kind: input, shape index: {}]   ;;  %s1246_s4 = inlined_call_operand.hbm [shape: f32[1,32], index: 4, kind: input, shape index: {}]   ;;  %s1247_s5 = inlined_call_operand.vmem [shape: bf16[32,16], index: 5, kind: input, shape index: {}]   ;;  %s1248_s6 = inlined_call_operand.hbm [shape: f32[1,16], index: 6, kind: input, shape index: {}]   ;;  %s1249_s7 = inlined_call_operand.vmem [shape: bf16[16,16], index: 7, kind: input, shape index: {}]   ;;  %s1250_s8 = inlined_call_operand.vmem [shape: f32[1,16], index: 8, kind: input, shape index: {}]   ;;  %s1251_s9 = inlined_call_operand.vmem [shape: bf16[16,4], index: 9, kind: input, shape index: {}]   ;;  %s1252_s10 = inlined_call_operand.vmem [shape: f32[1,4], index: 10, kind: input, shape index: {}]   ;;  %s1253_s11 = inlined_call_operand.vmem [shape: bf16[32,128], index: 11, kind: input, shape index: {}]   ;;  %s1254_s12 = inlined_call_operand.vmem [shape: f32[1,128], index: 12, kind: input, shape index: {}]   ;;  %s1255_s13 = inlined_call_operand.vmem [shape: bf16[32,128], index: 13, kind: input, shape index: {}]   ;;  %s1256_s14 = inlined_call_operand.vmem [shape: f32[1,128], index: 14, kind: input, shape index: {}]   ;;  %s1257_s15 = inlined_call_operand.vmem [shape: bf16[32,128], index: 15, kind: input, shape index: {}]   ;;  %s1258_s16 = inlined_call_operand.vmem [shape: f32[1,128], index: 16, kind: input, shape index: {}]   ;;  %s1259_s17 = inlined_call_operand.hbm [shape: f32[8,32], index: 17, kind: output, shape index: {}]  }
   0x1   :  { %1262 = sst [smem:[#allocation19_spill]] %s1242_s0 }
   0x2   :  { %1263 = sst [smem:[#allocation20_spill]] %s1243_s1 }
   0x3   :  { %22 = vsyncpa [#allocation3], 0 }
   0x4   :  { %23 = vsyncpa [#allocation6], 0 }
   0x5   :  { %24 = vsyncpa [#allocation9], 0 }
   0x6   :  { %25 = vsyncpa [#allocation12], 0 }
   0x7   :  { %26 = vsyncpa [#allocation4], 0  ;;  %s961_s24 = smov [#allocation5]   ;;  %s962_s26 = smov [#allocation8]  }
   0x8   :  { %s43_s25 = sshll.u32 %s961_s24, 4  ;;  %s63_s27 = sshll.u32 %s962_s26, 4  ;;  %s44_s25 = int_to_ptr.vmem [resolvable:$true] %s43_s25  ;;  %s64_s27 = int_to_ptr.vmem [resolvable:$true] %s63_s27 }
   0x9   :  { %s1264_s0 = sld [smem:[#allocation20_spill]] }
   0xf   :  { %s797_s30 = scalar_lea.hbm %s1264_s0, 16 }
  0x10   :  { %p798_p0 = scmp.ne.s32.totalorder %s1264_s0, %s797_s30  ;;  %p801_p1 = scmp.lt.u32.totalorder %s797_s30, %s1264_s0 }
  0x12   :  { %p803_p2 = pnand %p801_p1, %p798_p0 }
  0x14   :  { %806 = shalt.err (!%p803_p2)
}
  0x15   :  { %s807_s21 = scalar_lea.vmem %s44_s25, 16  ;;  %s811_s22 = scalar_lea.vmem %s44_s25, 32 }
  0x16   :  { %p808_p3 = scmp.ne.s32.totalorder %s44_s25, %s807_s21  ;;  %p812_p4 = scmp.lt.s32.totalorder %s44_s25, %s44_s25 }
  0x17   :  { %p813_p5 = scmp.lt.s32.totalorder %s811_s22, %s807_s21 }
  0x19   :  { %p814_p6 = por %p813_p5, %p812_p4 }
  0x1b   :  { %p815_p7 = pnand %p814_p6, %p808_p3 }
  0x1d   :  { %818 = shalt.err (!%p815_p7)
}
  0x1e   :  { %46 = dma.hbm_to_vmem [thread:$0]  %s1264_s0, 16, %s44_s25, [#allocation6]  }
  0x1f   :  { %s819_s29 = scalar_lea.hbm %s1245_s3, 16 }
  0x20   :  { %p820_p8 = scmp.ne.s32.totalorder %s1245_s3, %s819_s29  ;;  %p823_p9 = scmp.lt.u32.totalorder %s819_s29, %s1245_s3 }
  0x22   :  { %p825_p10 = pnand %p823_p9, %p820_p8 }
  0x24   :  { %828 = shalt.err (!%p825_p10)
}
  0x25   :  { %s829_s20 = scalar_lea.vmem %s64_s27, 16  ;;  %s833_s21 = scalar_lea.vmem %s64_s27, 32 }
  0x26   :  { %p830_p11 = scmp.ne.s32.totalorder %s64_s27, %s829_s20  ;;  %p834_p12 = scmp.lt.s32.totalorder %s64_s27, %s64_s27 }
  0x27   :  { %p835_p13 = scmp.lt.s32.totalorder %s833_s21, %s829_s20 }
  0x29   :  { %p836_p0 = por %p835_p13, %p834_p12 }
  0x2b   :  { %p837_p1 = pnand %p836_p0, %p830_p11 }
  0x2d   :  { %840 = shalt.err (!%p837_p1)
}
  0x2e   :  { %66 = dma.hbm_to_vmem [thread:$0]  %s1245_s3, 16, %s64_s27, [#allocation9]  }
  0x2f   :  { %s963_s22 = smov [#allocation2]   ;;  %s964_s24 = smov [#allocation7]  }
  0x30   :  { %s33_s23 = sshll.u32 %s963_s22, 4  ;;  %s53_s26 = sshll.u32 %s964_s24, 4  ;;  %s34_s23 = int_to_ptr.vmem [resolvable:$true] %s33_s23  ;;  %s54_s26 = int_to_ptr.vmem [resolvable:$true] %s53_s26 }
  0x31   :  { %s1265_s18 = sld [smem:[#allocation19_spill]] }
  0x37   :  { %s841_s30 = scalar_lea.hbm %s1265_s18, 128 }
  0x38   :  { %p842_p2 = scmp.ne.s32.totalorder %s1265_s18, %s841_s30  ;;  %p845_p3 = scmp.lt.u32.totalorder %s841_s30, %s1265_s18 }
  0x3a   :  { %p847_p4 = pnand %p845_p3, %p842_p2 }
  0x3c   :  { %850 = shalt.err (!%p847_p4)
}
  0x3d   :  { %s851_s3 = scalar_lea.vmem %s34_s23, 128  ;;  %p856_p6 = scmp.lt.s32.totalorder %s34_s23, %s34_s23 }
  0x3e   :  { %p852_p5 = scmp.ne.s32.totalorder %s34_s23, %s851_s3  ;;  %p857_p7 = scmp.lt.s32.totalorder %s851_s3, %s851_s3 }
  0x40   :  { %p858_p8 = por %p857_p7, %p856_p6 }
  0x42   :  { %p859_p9 = pnand %p858_p8, %p852_p5 }
  0x44   :  { %862 = shalt.err (!%p859_p9)
}
  0x45   :  { %36 = dma.hbm_to_vmem [thread:$0]  %s1265_s18, 128, %s34_s23, [#allocation3]  }
  0x46   :  { %s863_s24 = scalar_lea.hbm %s1244_s2, 16 }
  0x47   :  { %p864_p10 = scmp.ne.s32.totalorder %s1244_s2, %s863_s24  ;;  %p867_p11 = scmp.lt.u32.totalorder %s863_s24, %s1244_s2 }
  0x49   :  { %p869_p12 = pnand %p867_p11, %p864_p10 }
  0x4b   :  { %872 = shalt.err (!%p869_p12)
}
  0x4c   :  { %s873_s1 = scalar_lea.vmem %s54_s26, 16  ;;  %s877_s20 = scalar_lea.vmem %s54_s26, 32 }
  0x4d   :  { %p874_p13 = scmp.ne.s32.totalorder %s54_s26, %s873_s1  ;;  %p878_p0 = scmp.lt.s32.totalorder %s54_s26, %s54_s26 }
  0x4e   :  { %p879_p1 = scmp.lt.s32.totalorder %s877_s20, %s873_s1 }
  0x50   :  { %p880_p2 = por %p879_p1, %p878_p0 }
  0x52   :  { %p881_p3 = pnand %p880_p2, %p874_p13 }
  0x54   :  { %884 = shalt.err (!%p881_p3)
}
  0x55   :  { %56 = dma.hbm_to_vmem [thread:$0]  %s1244_s2, 16, %s54_s26, [#allocation6]  }
  0x56   :  { %s965_s21 = smov [#allocation10]   ;;  %s966_s27 = smov [#allocation11]  }
  0x57   :  { %s73_s3 = sshll.u32 %s965_s21, 4  ;;  %s85_s25 = sshll.u32 %s966_s27, 4  ;;  %s74_s3 = int_to_ptr.vmem [resolvable:$true] %s73_s3  ;;  %s86_s25 = int_to_ptr.vmem [resolvable:$true] %s85_s25 }
  0x58   :  { %s885_s24 = scalar_lea.hbm %s1246_s4, 16 }
  0x59   :  { %p886_p4 = scmp.ne.s32.totalorder %s1246_s4, %s885_s24  ;;  %p889_p5 = scmp.lt.u32.totalorder %s885_s24, %s1246_s4 }
  0x5b   :  { %p891_p6 = pnand %p889_p5, %p886_p4 }
  0x5d   :  { %894 = shalt.err (!%p891_p6)
}
  0x5e   :  { %s895_s2 = scalar_lea.vmem %s74_s3, 16  ;;  %s899_s26 = scalar_lea.vmem %s74_s3, 32 }
  0x5f   :  { %p896_p7 = scmp.ne.s32.totalorder %s74_s3, %s895_s2  ;;  %p900_p8 = scmp.lt.s32.totalorder %s74_s3, %s74_s3 }
  0x60   :  { %p901_p9 = scmp.lt.s32.totalorder %s899_s26, %s895_s2 }
  0x62   :  { %p902_p10 = por %p901_p9, %p900_p8 }
  0x64   :  { %p903_p11 = pnand %p902_p10, %p896_p7 }
  0x66   :  { %906 = shalt.err (!%p903_p11)
}
  0x67   :  { %76 = dma.hbm_to_vmem [thread:$0]  %s1246_s4, 16, %s74_s3, [#allocation9]  }
  0x68   :  { %s907_s21 = scalar_lea.hbm %s1248_s6, 16 }
  0x69   :  { %p908_p12 = scmp.ne.s32.totalorder %s1248_s6, %s907_s21  ;;  %p911_p13 = scmp.lt.u32.totalorder %s907_s21, %s1248_s6 }
  0x6b   :  { %p913_p0 = pnand %p911_p13, %p908_p12 }
  0x6d   :  { %916 = shalt.err (!%p913_p0)
}
  0x6e   :  { %s917_s28 = scalar_lea.vmem %s86_s25, 16  ;;  %s921_s29 = scalar_lea.vmem %s86_s25, 32 }
  0x6f   :  { %p918_p1 = scmp.ne.s32.totalorder %s86_s25, %s917_s28  ;;  %p922_p2 = scmp.lt.s32.totalorder %s86_s25, %s86_s25 }
  0x70   :  { %p923_p3 = scmp.lt.s32.totalorder %s921_s29, %s917_s28 }
  0x72   :  { %p924_p4 = por %p923_p3, %p922_p2 }
  0x74   :  { %p925_p5 = pnand %p924_p4, %p918_p1 }
  0x76   :  { %928 = shalt.err (!%p925_p5)
}
  0x77   :  { %88 = dma.hbm_to_vmem [thread:$0]  %s1248_s6, 16, %s86_s25, [#allocation12]  }
  0x78   :  { %951 = dma.done.wait [#allocation3], 128  }
  0x79   :  { %952 = vsyncadd [#allocation3], 4294967168 }
  0x7a   :  { %953 = dma.done.wait [#allocation6], 32  }
  0x7b   :  { %954 = vsyncadd [#allocation6], 4294967264 }
  0x7c   :  { %955 = dma.done.wait [#allocation9], 32  }
  0x7d   :  { %956 = vsyncadd [#allocation9], 4294967264 }
  0x7e   :  { %957 = dma.done.wait [#allocation12], 16  }
  0x7f   :  { %958 = vsyncadd [#allocation12], 4294967280  ;;  %v967_v0 = vmov 0.0   ;;  %vm968_vm0 = vmmov 0   ;;  %v775_v1 = vld [vmem:[%s1247_s5] sm:$0xff]   ;;  %v776_v2 = vld [vmem:[%s1247_s5 + $0x8] sm:$0xff]  }
  0x80   :  { %710 = vmatprep.subr.bf16.mxu0 %v967_v0  ;;  %714 = vmatprep.mubr.msk.bf16.mxu0 %vm968_vm0, %v967_v0  ;;  %v128_v3 = vld [vmem:[#allocation2] sm:$0xff]  ;;  %v664_v4 = vld [vmem:[#allocation5] ss:$0 sm:$0xff]  ;;  %v665_v5 = vld [vmem:[#allocation7] ss:$0 sm:$0xff]  ;;  %vm169_vm1 = vcmask 261120  }
  0x81   :  { %718 = vmatprep.subr.bf16.mxu1 %v967_v0  ;;  %720 = vmatprep.mubr.msk.bf16.mxu1 %vm968_vm0, %v967_v0  ;;  %v136_v6 = vsub.f32 %v128_v3, %v664_v4  ;;  %v777_v9 = vld [vmem:[%s1249_s7] sm:$0xff]   ;;  %v666_v10 = vld [vmem:[#allocation11] ss:$0 sm:$0xff]  ;;  %vm235_vm3 = vcmask 130048   ;;  %vm344_vm5 = vcmask 31744   ;;  %v780_v43 = vld [vmem:[%s1253_s11 + $0x8] sm:$0xff]  }
  0x82   :  { %711 = vmatpush3.bf16.msra.mxu0 %v775_v1  ;;  %719 = vmatpush3.bf16.msra.mxu1 %v777_v9  ;;  %v778_v22 = vld [vmem:[%s1251_s9] sm:$0xff]   ;;  %v969_v49 = vmov 2   ;;  %v970_v50 = vmov 0   ;;  %v971_v54 = vmov 1   ;;  %v972_v55 = vmov 3   ;;  %s973_s0 = smov 96  }
  0x83   :  { %712 = vmatprep.subr.bf16.mxu0 %v967_v0  ;;  %v144_v7 = vmul.f32 %v665_v5, %v136_v6  ;;  %724 = vmatprep.subr.bf16.mxu1 %v967_v0  ;;  %v671_v23 = vld [vmem:[%s1250_s8] ss:$0 sm:$0xff]  ;;  %vm437_vm6 = vcmask 523264   ;;  %vm439_vm7 = vcmask 785408   ;;  %s974_s22 = smov 64   ;;  %s975_s24 = smov 32  }
  0x84   :  { %v675_v35 = vld [vmem:[%s1252_s10] ss:$0 sm:$0xff]  ;;  %772 = vset.pattern.permute.xlu0 %v969_v49  ;;  %770 = vset.pattern.permute.xlu1 %v970_v50 }
  0x85   :  { %v145_v8 = vpack.c.bf16 %v144_v7, %v144_v7  ;;  %v779_v42 = vld [vmem:[%s1253_s11] sm:$0xff]  }
  0x86   :  { %713 = vmatpush3.bf16.msra.mxu0 %v776_v2  ;;  %v678_v62 = vld [vmem:[%s1254_s12] ss:$0 sm:$0xff] }
  0x87   :  { %730 = vmatprep.subr.bf16.mxu0 %v967_v0  ;;  %v781_v7 = vld [vmem:[%s1255_s13] sm:$0xff]  }
  0x89   :  { %715 = vmatmul.mubr.msk.bf16.vlgmr.msra.gmra.mrb[0].mxu0 %vm169_vm1, %v145_v8 }
  0x8a   :  { %734 = vmatprep.mubr.msk.bf16.mxu0 %vm968_vm0, %v967_v0  ;;  %731 = vmatpush3.bf16.msra.mxu0 %v779_v42 }
  0x8b   :  { %732 = vmatprep.subr.bf16.mxu0 %v967_v0 }
  0x8e   :  { %733 = vmatpush3.bf16.msra.mxu0 %v780_v43 }
  0x8f   :  { %746 = vmatprep.subr.bf16.mxu0 %v967_v0 }
  0x91   :  { %735 = vmatmul.mubr.msk.bf16.vlgmr.msra.gmra.mrb[4].mxu0 %vm169_vm1, %v145_v8  ;;  %v782_v8 = vld [vmem:[%s1255_s13 + $0x8] sm:$0xff]  }
  0x92   :  { %750 = vmatprep.mubr.msk.bf16.mxu0 %vm968_vm0, %v967_v0 }
 0x15c   :  { %v207_v11 = vpop.f32.mrb[0].mxu0 }
 0x15d   :  { %v208_v12 = vadd.f32 %v666_v10, %v207_v11  ;;  %v716_v13 = vpop.f32.mrb[1].mxu0 }
 0x15e   :  { %v210_v14 = vpop.f32.mrb[2].mxu0 }
 0x15f   :  { %v214_v15 = vmin.f32 %v208_v12, 0.0  ;;  %v717_v16 = vpop.f32.mrb[3].mxu0  ;;  %vm213_vm2 = vcmp.gt.f32.partialorder %v208_v12, 0.0 }
 0x161   :  { %v215_v17 = vmul.f32 1.442695, %v214_v15 }
 0x163   :  { %785 = vpow2.f32 %v215_v17 }
 0x164   :  { %v413_v56 = vpop.f32.mrb[4].mxu0 }
 0x165   :  { %v736_v57 = vpop.f32.mrb[5].mxu0  ;;  %v414_v1 = vadd.f32 %v678_v62, %v413_v56 }
 0x166   :  { %v416_v58 = vpop.f32.mrb[6].mxu0 }
 0x167   :  { %v737_v59 = vpop.f32.mrb[7].mxu0 }
 0x16d   :  { %v786_v18 = vpop.eup %785 }
 0x16e   :  { %v670_v19 = vadd.f32 -1.0, %v786_v18 }
 0x170   :  { %v218_v20 = vsel %vm213_vm2, %v208_v12, %v670_v19 }
 0x171   :  { %v219_v21 = vpack.c.bf16 %v218_v20, %v218_v20 }
 0x173   :  { %721 = vmatmul.mubr.msk.bf16.vlgmr.msra.gmra.mrb[0].mxu1 %vm235_vm3, %v219_v21  ;;  %v683_v21 = vld [vmem:[%s1256_s14] ss:$0 sm:$0xff] }
 0x174   :  { %726 = vmatprep.mubr.msk.bf16.mxu1 %vm968_vm0, %v967_v0  ;;  %725 = vmatpush3.bf16.msra.mxu1 %v778_v22 }
 0x175   :  { %738 = vmatprep.subr.bf16.mxu1 %v967_v0 }
 0x246   :  { %v273_v24 = vpop.f32.mrb[0].mxu1 }
 0x247   :  { %v274_v25 = vadd.f32 %v671_v23, %v273_v24  ;;  %v722_v26 = vpop.f32.mrb[1].mxu1 }
 0x248   :  { %v276_v27 = vpop.f32.mrb[2].mxu1 }
 0x249   :  { %v280_v28 = vmin.f32 %v274_v25, 0.0  ;;  %v723_v29 = vpop.f32.mrb[3].mxu1  ;;  %vm279_vm4 = vcmp.gt.f32.partialorder %v274_v25, 0.0 }
 0x24a   :  { %v784_v29 = vld [vmem:[%s1257_s15 + $0x8] sm:$0xff]  }
 0x24b   :  { %v281_v30 = vmul.f32 1.442695, %v280_v28  ;;  %v783_v28 = vld [vmem:[%s1257_s15] sm:$0xff]   ;;  %s976_s15 = smov [#allocation13]  }
 0x24c   :  { %747 = vmatpush3.bf16.msra.mxu0 %v783_v28 }
 0x24d   :  { %787 = vpow2.f32 %v281_v30  ;;  %748 = vmatprep.subr.bf16.mxu0 %v967_v0 }
 0x250   :  { %749 = vmatpush3.bf16.msra.mxu0 %v784_v29 }
 0x257   :  { %v788_v31 = vpop.eup %787 }
 0x258   :  { %v674_v32 = vadd.f32 -1.0, %v788_v31 }
 0x25a   :  { %v284_v33 = vsel %vm279_vm4, %v274_v25, %v674_v32 }
 0x25b   :  { %v285_v34 = vpack.c.bf16 %v284_v33, %v284_v33 }
 0x25d   :  { %727 = vmatmul.mubr.msk.bf16.vlgmr.msra.gmra.mrb[4].mxu1 %vm235_vm3, %v285_v34 }
 0x25e   :  { %742 = vmatprep.mubr.msk.bf16.mxu1 %vm968_vm0, %v967_v0  ;;  %739 = vmatpush3.bf16.msra.mxu1 %v781_v7 }
 0x25f   :  { %740 = vmatprep.subr.bf16.mxu1 %v967_v0  ;;  %v688_v0 = vld [vmem:[%s1258_s16] ss:$0 sm:$0xff]  ;;  %s652_s16 = sshll.u32 %s976_s15, 4  ;;  %s653_s16 = int_to_ptr.vmem [resolvable:$true] %s652_s16 }
 0x260   :  { %s929_s5 = scalar_lea.vmem %s653_s16, 128  ;;  %p934_p7 = scmp.lt.s32.totalorder %s653_s16, %s653_s16 }
 0x261   :  { %p930_p6 = scmp.ne.s32.totalorder %s653_s16, %s929_s5  ;;  %p935_p8 = scmp.lt.s32.totalorder %s929_s5, %s929_s5 }
 0x262   :  { %741 = vmatpush3.bf16.msra.mxu1 %v782_v8 }
 0x263   :  { %p936_p9 = por %p935_p8, %p934_p7 }
 0x265   :  { %p937_p10 = pnand %p936_p9, %p930_p6 }
 0x330   :  { %v338_v36 = vpop.f32.mrb[4].mxu1 }
 0x331   :  { %v339_v37 = vadd.f32 %v675_v35, %v338_v36  ;;  %v728_v38 = vpop.f32.mrb[5].mxu1 }
 0x332   :  { %v341_v39 = vpop.f32.mrb[6].mxu1 }
 0x333   :  { %v729_v40 = vpop.f32.mrb[7].mxu1  ;;  %v345_v41 = vsel %vm344_vm5, %v339_v37, -inf }
 0x334   :  { %346 = vmax.xlane.f32.xlu0 %v345_v41 }
 0x3c1   :  { %v347_v44 = vpop.xlane.xlu0 %346 }
 0x3c2   :  { %v348_v45 = vsub.f32 %v339_v37, %v347_v44 }
 0x3c4   :  { %v349_v46 = vmul.f32 1.442695, %v348_v45 }
 0x3c6   :  { %789 = vpow2.f32 %v349_v46 }
 0x3d0   :  { %v790_v47 = vpop.eup %789 }
 0x3d1   :  { %v351_v48 = vsel %vm344_vm5, %v790_v47, 0.0 }
 0x3d2   :  { %352 = vadd.xlane.f32.xlu0 %v351_v48 }
 0x45f   :  { %v353_v51 = vpop.xlane.xlu0 %352 }
 0x460   :  { %791 = vrcp.f32 %v353_v51 }
 0x46a   :  { %v792_v52 = vpop.eup %791 }
 0x46b   :  { %v355_v53 = vmul.f32 %v792_v52, %v790_v47  ;;  %v692_v52 = vld [vmem:[#allocation10] ss:$0 sm:$0xff] }
 0x46d   :  { %429 = vperm.xlu0 %772, %v355_v53   ;;  %421 = vperm.xlu1 %770, %v355_v53  }
 0x471   :  { %771 = vset.pattern.permute.xlu1 %v971_v54  ;;  %774 = vset.pattern.permute.xlu0 %v972_v55 }
 0x472   :  { %425 = vperm.xlu1 %771, %v355_v53  }
 0x476   :  { %773 = vset.pattern.permute.xlu1 %v972_v55  ;;  %v693_v55 = vld [vmem:[#allocation8] ss:$0 sm:$0xff] }
 0x477   :  { %433 = vperm.xlu1 %773, %v355_v53  }
 0x4ec   :  { %v422_v60 = vpop.permute.xlu1 %421  ;;  %v430_v2 = vpop.permute.xlu0 %429 }
 0x4f1   :  { %v426_v61 = vpop.permute.xlu1 %425 }
 0x4f2   :  { %v436_v63 = vsel %vm169_vm1, %v422_v60, %v426_v61 }
 0x4f3   :  { %v438_v3 = vsel %vm437_vm6, %v436_v63, %v430_v2 }
 0x4f6   :  { %v434_v4 = vpop.permute.xlu1 %433 }
 0x4f7   :  { %v1193_v5 = vsel %vm439_vm7, %v438_v3, %v434_v4 }
 0x4f8   :  { %v441_v6 = vmul.f32 %v1193_v5, %v414_v1 }
 0x4fa   :  { %443 = vrot.lane.b32.xlu1 %v441_v6, %s973_s0 }
 0x4fe   :  { %447 = vrot.lane.b32.xlu1 %v441_v6, %s974_s22 }
 0x502   :  { %451 = vrot.lane.b32.xlu1 %v441_v6, %s975_s24 }
 0x56c   :  { %v444_v9 = vpop.permute.xlu1 %443 }
 0x56d   :  { %v446_v11 = vadd.f32 %v444_v9, %v441_v6 }
 0x570   :  { %v448_v10 = vpop.permute.xlu1 %447 }
 0x571   :  { %v450_v12 = vadd.f32 %v448_v10, %v446_v11 }
 0x574   :  { %v452_v13 = vpop.permute.xlu1 %451 }
 0x575   :  { %v454_v14 = vadd.f32 %v452_v13, %v450_v12 }
 0x577   :  { %v456_v15 = vmin.f32 %v454_v14, 0.0  ;;  %vm455_vm8 = vcmp.gt.f32.partialorder %v454_v14, 0.0 }
 0x579   :  { %v457_v16 = vmul.f32 1.442695, %v456_v15 }
 0x57b   :  { %793 = vpow2.f32 %v457_v16 }
 0x585   :  { %v794_v17 = vpop.eup %793 }
 0x586   :  { %v682_v18 = vadd.f32 -1.0, %v794_v17 }
 0x588   :  { %v460_v19 = vsel %vm455_vm8, %v454_v14, %v682_v18 }
 0x589   :  { %v461_v20 = vpack.c.bf16 %v460_v19, %v460_v19 }
 0x58b   :  { %743 = vmatmul.mubr.msk.bf16.vlgmr.msra.gmra.mrb[8].mxu1 %vm169_vm1, %v461_v20 }
 0x65e   :  { %v522_v22 = vpop.f32.mrb[8].mxu1 }
 0x65f   :  { %v523_v23 = vadd.f32 %v683_v21, %v522_v22  ;;  %v744_v24 = vpop.f32.mrb[9].mxu1 }
 0x660   :  { %v525_v25 = vpop.f32.mrb[10].mxu1 }
 0x661   :  { %v528_v26 = vmul.f32 %v523_v23, %v1193_v5  ;;  %v745_v27 = vpop.f32.mrb[11].mxu1 }
 0x663   :  { %530 = vrot.lane.b32.xlu1 %v528_v26, %s973_s0 }
 0x667   :  { %534 = vrot.lane.b32.xlu1 %v528_v26, %s974_s22 }
 0x66b   :  { %538 = vrot.lane.b32.xlu1 %v528_v26, %s975_s24 }
 0x6d5   :  { %v531_v30 = vpop.permute.xlu1 %530 }
 0x6d6   :  { %v533_v32 = vadd.f32 %v531_v30, %v528_v26 }
 0x6d9   :  { %v535_v31 = vpop.permute.xlu1 %534 }
 0x6da   :  { %v537_v33 = vadd.f32 %v535_v31, %v533_v32 }
 0x6dd   :  { %v539_v34 = vpop.permute.xlu1 %538 }
 0x6de   :  { %v541_v35 = vadd.f32 %v539_v34, %v537_v33 }
 0x6e0   :  { %v543_v36 = vmin.f32 %v541_v35, 0.0  ;;  %vm542_vm9 = vcmp.gt.f32.partialorder %v541_v35, 0.0 }
 0x6e2   :  { %v544_v37 = vmul.f32 1.442695, %v543_v36 }
 0x6e4   :  { %795 = vpow2.f32 %v544_v37 }
 0x6ee   :  { %v796_v38 = vpop.eup %795 }
 0x6ef   :  { %v687_v39 = vadd.f32 -1.0, %v796_v38 }
 0x6f1   :  { %v547_v40 = vsel %vm542_vm9, %v541_v35, %v687_v39 }
 0x6f2   :  { %v548_v41 = vpack.c.bf16 %v547_v40, %v547_v40 }
 0x6f4   :  { %751 = vmatmul.mubr.msk.bf16.vlgmr.msra.gmra.mrb[8].mxu0 %vm169_vm1, %v548_v41 }
 0x7c7   :  { %v609_v42 = vpop.f32.mrb[8].mxu0 }
 0x7c8   :  { %v610_v43 = vadd.f32 %v688_v0, %v609_v42  ;;  %v752_v44 = vpop.f32.mrb[9].mxu0 }
 0x7c9   :  { %v612_v45 = vpop.f32.mrb[10].mxu0 }
 0x7ca   :  { %v615_v46 = vmul.f32 %v610_v43, %v1193_v5  ;;  %v753_v47 = vpop.f32.mrb[11].mxu0 }
 0x7cc   :  { %617 = vrot.lane.b32.xlu1 %v615_v46, %s973_s0 }
 0x7d0   :  { %621 = vrot.lane.b32.xlu1 %v615_v46, %s974_s22 }
 0x7d4   :  { %625 = vrot.lane.b32.xlu1 %v615_v46, %s975_s24 }
 0x83e   :  { %v618_v48 = vpop.permute.xlu1 %617 }
 0x83f   :  { %v620_v50 = vadd.f32 %v618_v48, %v615_v46 }
 0x842   :  { %v622_v49 = vpop.permute.xlu1 %621 }
 0x843   :  { %v624_v51 = vadd.f32 %v622_v49, %v620_v50 }
 0x846   :  { %v626_v53 = vpop.permute.xlu1 %625 }
 0x847   :  { %v628_v54 = vadd.f32 %v626_v53, %v624_v51 }
 0x849   :  { %v636_v56 = vmul.f32 %v692_v52, %v628_v54 }
 0x84b   :  { %v644_v57 = vadd.f32 %v693_v55, %v636_v56 }
 0x84d   :  { %645 = vst.msk [vmem:[#allocation13] sm:$0xff] %vm169_vm1, %v644_v57 }
 0x84e   :  { %940 = shalt.err (!%p937_p10)
}
 0x84f   :  { %s941_s1 = scalar_lea.hbm %s1259_s17, 128 }
 0x850   :  { %p942_p11 = scmp.ne.s32.totalorder %s1259_s17, %s941_s1  ;;  %p945_p12 = scmp.lt.u32.totalorder %s941_s1, %s1259_s17 }
 0x852   :  { %p947_p13 = pnand %p945_p12, %p942_p11 }
 0x854   :  { %950 = shalt.err (!%p947_p13)
}
 0x855   :  { %655 = dma.vmem_to_hbm [thread:$0]  %s653_s16, 128, %s1259_s17, [#allocation4]  }
 0x856   :  { %959 = dma.done.wait [#allocation4], 128  }
 0x857   :  { %960 = vsyncadd [#allocation4], 4294967168 }
 0x858   :  { %659 = vsyncpa [#allocation3], 1 }
 0x859   :  { %660 = vsyncpa [#allocation6], 1 }
 0x85a   :  { %661 = vsyncpa [#allocation9], 1 }
 0x85b   :  { %662 = vsyncpa [#allocation12], 1 }
 0x85c   :  { %663 = vsyncpa [#allocation4], 1 }

</bundles_post_ra>
